<compile_context>
chip_gen: v7x
topology: tpu7x:2x2x1
jax: 0.10.0
libtpu: 0.0.40
codegen_flags: <defaults>
</compile_context>

<pallas_src>
import functools

import jax
import jax.numpy as jnp
from jax.experimental import pallas as pl
from jax.experimental.pallas import tpu as pltpu


def _onehot_gather_kernel(ids_ref, emb_ref, out_ref, acc_ref, *, v_chunk: int):
    """One (token-block, vocab-chunk) step of the embedding gather.

    ids_ref : VMEM (TB, 1) int32   -- token ids for this block (clamped to [0, V-1])
    emb_ref : VMEM (Vc, D)         -- one vocab chunk of the embedding table
    out_ref : VMEM (TB, D)         -- output rows for this token block
    acc_ref : VMEM (TB, D) f32     -- accumulator across vocab chunks
    """
    vi = pl.program_id(1)

    @pl.when(vi == 0)
    def _():
        acc_ref[...] = jnp.zeros_like(acc_ref)

    ids = ids_ref[...]                                     # (TB, 1) int32
    local = ids - vi * v_chunk                             # id relative to this chunk
    tb = ids.shape[0]
    col = jax.lax.broadcasted_iota(jnp.int32, (tb, v_chunk), 1)
    onehot = (col == local).astype(emb_ref.dtype)          # (TB, Vc), exactly 0/1
    acc_ref[...] += jnp.dot(onehot, emb_ref[...],
                            preferred_element_type=jnp.float32)

    @pl.when(vi == pl.num_programs(1) - 1)
    def _():
        out_ref[...] = acc_ref[...].astype(out_ref.dtype)


def pokedex_embedding_forward(x: jax.Array,
                              table: jax.Array,
                              tokens_per_block: int = 128,
                              chunk_budget_bytes: int = 4 * 1024 * 1024,
                              max_chunk_rows: int = 2048) -> jax.Array:
    """Equivalent of PokedexEmbedding.forward: table[x] (gather of embedding rows)."""
    orig_shape = x.shape
    V, D = table.shape

    # Flatten, clamp (no runtime bounds check inside the kernel), pad token count to TB.
    ids = jnp.clip(x.reshape(-1).astype(jnp.int32), 0, V - 1)
    n = ids.shape[0]
    tb = tokens_per_block
    n_pad = pl.cdiv(n, tb) * tb
    if n_pad != n:
        ids = jnp.pad(ids, (0, n_pad - n))
    ids_col = ids.reshape(n_pad, 1)                        # (TB, 1) block per grid step

    # Pick a 256-aligned vocab chunk that fits the VMEM budget (Pallas double-buffers it).
    itemsize = jnp.dtype(table.dtype).itemsize
    rows_by_budget = max(256, (chunk_budget_bytes // max(D * itemsize, 1)) // 256 * 256)
    v_full = pl.cdiv(V, 256) * 256
    v_chunk = int(min(v_full, rows_by_budget, max_chunk_rows))
    v_pad = pl.cdiv(V, v_chunk) * v_chunk
    if v_pad != V:
        # Padded zero rows are never selected (ids are clamped to < V), so this is harmless.
        table = jnp.pad(table, ((0, v_pad - V), (0, 0)))
    n_vchunks = v_pad // v_chunk

    grid = (n_pad // tb, n_vchunks)                        # reduction (vocab) axis last

    out = pl.pallas_call(
        functools.partial(_onehot_gather_kernel, v_chunk=v_chunk),
        out_shape=jax.ShapeDtypeStruct((n_pad, D), table.dtype),
        grid_spec=pltpu.PrefetchScalarGridSpec(
            num_scalar_prefetch=0,
            grid=grid,
            in_specs=[
                # token ids for this block (tiny int32 column, resident across vocab axis)
                pl.BlockSpec((tb, 1), lambda i, v: (i, 0)),
                # one vocab chunk of the embedding table
                pl.BlockSpec((v_chunk, D), lambda i, v: (v, 0)),
            ],
            # output block stays resident across the vocab axis (accumulator pattern)
            out_specs=pl.BlockSpec((tb, D), lambda i, v: (i, 0)),
            scratch_shapes=[pltpu.VMEM((tb, D), jnp.float32)],
        ),
        compiler_params=pltpu.CompilerParams(
            dimension_semantics=("parallel", "arbitrary"),
            vmem_limit_bytes=32 * 1024 * 1024,
        ),
    )(ids_col, table)

    out = out[:n]
    return out.reshape(*orig_shape, D)


if __name__ == "__main__":
    key = jax.random.PRNGKey(0)
    k_tab, k_ids = jax.random.split(key)

    # Synthetic frozen "pokedex" embedding table (stand-in for the pokedex.pt load).
    num_embeddings = 1024      # ~ pokedex size
    embedding_dim = 128
    table = jax.random.normal(k_tab, (num_embeddings, embedding_dim),
                              dtype=jnp.float32)

    # Small batch of token ids, shape (2, 8).
    x = jax.random.randint(k_ids, (2, 8), 0, num_embeddings, dtype=jnp.int32)

    out = pokedex_embedding_forward(x, table)
    out = jax.block_until_ready(out)

    # Cross-check against the plain-JAX reference (table[x]).
    ref = table[x]
    assert out.shape == (2, 8, embedding_dim)
    assert out.dtype == table.dtype
    assert jnp.allclose(out, ref), "mismatch vs reference gather"

    print("KERNEL_OK")
</pallas_src>

<mosaic_0001>
module attributes {stable_mosaic.version = 11 : i64} {
  func.func @_onehot_gather_kernel(%arg0: i32, %arg1: i32, %arg2: memref<128x1xi32, #tpu.memory_space<vmem>>, %arg3: memref<1024x128xf32, #tpu.memory_space<vmem>>, %arg4: memref<128x128xf32, #tpu.memory_space<vmem>>, %arg5: memref<128x128xf32, #tpu.memory_space<vmem>>) attributes {dimension_semantics = [#tpu.dimension_semantics<parallel>, #tpu.dimension_semantics<arbitrary>], iteration_bounds = array<i64: 1, 1>, scalar_prefetch = 0 : i64, scratch_operands = 1 : i64, tpu.core_type = #tpu.core_type<tc>, window_params = [{transform_indices = @transform_0, window_bounds = array<i64: 128, 1>}, {transform_indices = @transform_1, window_bounds = array<i64: 1024, 128>}, {transform_indices = @transform_2, window_bounds = array<i64: 128, 128>}]} {
    %c0_i32 = arith.constant 0 : i32
    %0 = arith.cmpi eq, %arg1, %c0_i32 : i32
    %1 = arith.extui %0 : i1 to i32
    %c0_i32_0 = arith.constant 0 : i32
    %2 = arith.cmpi ne, %1, %c0_i32_0 : i32
    scf.if %2 {
      %cst_10 = arith.constant 0.000000e+00 : f32
      %20 = vector.broadcast %cst_10 : f32 to vector<128x128xf32>
      %c0_11 = arith.constant 0 : index
      %c0_12 = arith.constant 0 : index
      %21 = vector.load %arg5[%c0_11, %c0_12] : memref<128x128xf32, #tpu.memory_space<vmem>>, vector<128x128xf32>
      tpu.vector_store %arg5[%c0_11, %c0_12], %20 {strides = array<i32>} : memref<128x128xf32, #tpu.memory_space<vmem>>, vector<128x128xf32>,
    } else {
    }
    %c0 = arith.constant 0 : index
    %c0_1 = arith.constant 0 : index
    %3 = vector.load %arg2[%c0, %c0_1] : memref<128x1xi32, #tpu.memory_space<vmem>>, vector<128x1xi32>
    %c1024_i32 = arith.constant 1024 : i32
    %4 = arith.muli %arg1, %c1024_i32 : i32
    %5 = vector.broadcast %4 : i32 to vector<128x1xi32>
    %6 = arith.subi %3, %5 : vector<128x1xi32>
    %7 = tpu.iota {dimensions = array<i32: 1>} : vector<128x1024xi32>
    %8 = vector.broadcast %6 : vector<128x1xi32> to vector<128x1024xi32>
    %9 = arith.cmpi eq, %7, %8 : vector<128x1024xi32>
    %10 = arith.extui %9 : vector<128x1024xi1> to vector<128x1024xi32>
    %11 = arith.sitofp %10 : vector<128x1024xi32> to vector<128x1024xf32>
    %c0_2 = arith.constant 0 : index
    %c0_3 = arith.constant 0 : index
    %12 = vector.load %arg5[%c0_2, %c0_3] : memref<128x128xf32, #tpu.memory_space<vmem>>, vector<128x128xf32>
    %c0_4 = arith.constant 0 : index
    %c0_5 = arith.constant 0 : index
    %13 = vector.load %arg3[%c0_4, %c0_5] : memref<1024x128xf32, #tpu.memory_space<vmem>>, vector<1024x128xf32>
    %cst = arith.constant dense<0.000000e+00> : vector<128x128xf32>
    %14 = tpu.matmul %11, %13, %cst {dimension_numbers = #tpu.dot_dimension_numbers<[1], [0], [0], [1], [0, 0, 1, 1], [], []>} : vector<128x1024xf32>, vector<1024x128xf32>, vector<128x128xf32> -> vector<128x128xf32>
    %15 = arith.addf %12, %14 : vector<128x128xf32>
    %c0_6 = arith.constant 0 : index
    %c0_7 = arith.constant 0 : index
    %16 = vector.load %arg5[%c0_6, %c0_7] : memref<128x128xf32, #tpu.memory_space<vmem>>, vector<128x128xf32>
    tpu.vector_store %arg5[%c0_6, %c0_7], %15 {strides = array<i32>} : memref<128x128xf32, #tpu.memory_space<vmem>>, vector<128x128xf32>,
    %c0_i32_8 = arith.constant 0 : i32
    %17 = arith.cmpi eq, %arg1, %c0_i32_8 : i32
    %18 = arith.extui %17 : i1 to i32
    %c0_i32_9 = arith.constant 0 : i32
    %19 = arith.cmpi ne, %18, %c0_i32_9 : i32
    scf.if %19 {
      %c0_10 = arith.constant 0 : index
      %c0_11 = arith.constant 0 : index
      %20 = vector.load %arg5[%c0_10, %c0_11] : memref<128x128xf32, #tpu.memory_space<vmem>>, vector<128x128xf32>
      %c0_12 = arith.constant 0 : index
      %c0_13 = arith.constant 0 : index
      %21 = vector.load %arg4[%c0_12, %c0_13] : memref<128x128xf32, #tpu.memory_space<vmem>>, vector<128x128xf32>
      tpu.vector_store %arg4[%c0_12, %c0_13], %20 {strides = array<i32>} : memref<128x128xf32, #tpu.memory_space<vmem>>, vector<128x128xf32>,
    } else {
    }
    return
  }
  func.func @transform_0(%arg0: i32, %arg1: i32) -> (i32, i32) {
    %c0_i32 = arith.constant 0 : i32
    %c0_i32_0 = arith.constant 0 : i32
    return %arg0, %c0_i32 : i32, i32
  }
  func.func @transform_1(%arg0: i32, %arg1: i32) -> (i32, i32) {
    %c0_i32 = arith.constant 0 : i32
    %c0_i32_0 = arith.constant 0 : i32
    return %arg1, %c0_i32 : i32, i32
  }
  func.func @transform_2(%arg0: i32, %arg1: i32) -> (i32, i32) {
    %c0_i32 = arith.constant 0 : i32
    %c0_i32_0 = arith.constant 0 : i32
    return %arg0, %c0_i32 : i32, i32
  }
}

</mosaic_0001>

<bundles_post_ra>
// kernel: tpu_custom_call.1
= control target key start
LH: loop header
LB: loop body
LE: loop exit
PB: predicated region body
PF: predicated region fallthrough
CT: control target
= control target key end

     0   :  { %7 = vsyncpa [#allocation4], 0  ;;  %s2687_s0 = inlined_call_operand.vmem [shape: s32[128,1], index: 0, kind: input, shape index: {}]   ;;  %s2688_s1 = inlined_call_operand.hbm [shape: f32[1024,128], index: 1, kind: input, shape index: {}]   ;;  %s2689_s2 = inlined_call_operand.hbm [shape: f32[128,128], index: 2, kind: output, shape index: {}]  }
   0x1   :  { %8 = vsyncpa [#allocation5], 0  ;;  %s2089_s9 = smov [#allocation3]   ;;  %s2041_s13 = scalar_lea.hbm %s2688_s1, 16384 }
   0x2   :  { %s16_s10 = sshll.u32 %s2089_s9, 4  ;;  %p2042_p0 = scmp.ne.s32.totalorder %s2688_s1, %s2041_s13  ;;  %s17_s10 = int_to_ptr.vmem [resolvable:$true] %s16_s10 }
   0x3   :  { %p2045_p1 = scmp.lt.u32.totalorder %s2041_s13, %s2688_s1 }
   0x5   :  { %p2047_p2 = pnand %p2045_p1, %p2042_p0 }
   0x7   :  { %2050 = shalt.err (!%p2047_p2)
}
   0x8   :  { %s2051_s18 = scalar_lea.vmem %s17_s10, 16384  ;;  %p2056_p4 = scmp.lt.s32.totalorder %s17_s10, %s17_s10 }
   0x9   :  { %p2052_p3 = scmp.ne.s32.totalorder %s17_s10, %s2051_s18  ;;  %p2057_p5 = scmp.lt.s32.totalorder %s2051_s18, %s2051_s18 }
   0xb   :  { %p2058_p6 = por %p2057_p5, %p2056_p4 }
   0xd   :  { %p2059_p7 = pnand %p2058_p6, %p2052_p3 }
   0xf   :  { %2062 = shalt.err (!%p2059_p7)
}
  0x10   :  { %s2090_s19 = smov 128   ;;  %s2091_s20 = smov 8  }
  0x11   :  { %22 = dma.hbm_to_vmem [thread:$0]  %s2688_s1, 16384, %s17_s10, [#allocation4], %s2090_s19, %s2090_s19, %s2091_s20  }
  0x12   :  { %2085 = dma.done.wait [#allocation4], 16384  }
  0x13   :  { %2086 = vsyncadd [#allocation4], 4294950912  ;;  %v2092_v0 = vmov 0   ;;  %v48_v1 = vld [vmem:[%s2687_s0 + $0x10] sm:$0xff]  ;;  %v46_v2 = vld [vmem:[%s2687_s0] sm:$0xff] }
  0x14   :  { %2040 = vset.pattern.permute.xlu1 %v2092_v0  ;;  %2039 = vset.pattern.permute.xlu0 %v2092_v0  ;;  %v49_v3 = vld [vmem:[%s2687_s0 + $0x18] sm:$0xff]  ;;  %v47_v4 = vld [vmem:[%s2687_s0 + $0x8] sm:$0xff]  ;;  %v50_v6 = vld [vmem:[%s2687_s0 + $0x20] sm:$0xff] }
  0x15   :  { %96 = vperm.xlu1 %2040, %v48_v1   ;;  %90 = vperm.xlu0 %2039, %v46_v2   ;;  %v51_v5 = vld [vmem:[%s2687_s0 + $0x28] sm:$0xff]  ;;  %v553_v7 = vld [vmem:[#allocation3 + $0x80] sm:$0xff]  ;;  %v53_v17 = vld [vmem:[%s2687_s0 + $0x38] sm:$0xff] }
  0x16   :  { %v554_v8 = vld [vmem:[#allocation3 + $0x88] sm:$0xff]  ;;  %v537_v10 = vld [vmem:[#allocation3] sm:$0xff]  ;;  %v52_v18 = vld [vmem:[%s2687_s0 + $0x30] sm:$0xff] }
  0x17   :  { %v1905_v9 = vpack.c.bf16 %v554_v8, %v553_v7  ;;  %v538_v11 = vld [vmem:[#allocation3 + $0x8] sm:$0xff]  ;;  %v585_v12 = vld [vmem:[#allocation3 + $0x180] sm:$0xff]  ;;  %v555_v21 = vld [vmem:[#allocation3 + $0x90] sm:$0xff] }
  0x18   :  { %v1907_v13 = vpack.c.bf16 %v538_v11, %v537_v10  ;;  %v586_v14 = vld [vmem:[#allocation3 + $0x188] sm:$0xff]  ;;  %v569_v15 = vld [vmem:[#allocation3 + $0x100] sm:$0xff]  ;;  %v556_v22 = vld [vmem:[#allocation3 + $0x98] sm:$0xff] }
  0x19   :  { %99 = vperm.xlu1 %2040, %v49_v3   ;;  %93 = vperm.xlu0 %2039, %v47_v4   ;;  %v570_v16 = vld [vmem:[#allocation3 + $0x108] sm:$0xff]  ;;  %v1937_v19 = vpack.c.bf16 %v586_v14, %v585_v12  ;;  %v539_v23 = vld [vmem:[#allocation3 + $0x10] sm:$0xff]  ;;  %v1909_v24 = vpack.c.bf16 %v556_v22, %v555_v21  ;;  %v540_v25 = vld [vmem:[#allocation3 + $0x18] sm:$0xff] }
  0x1a   :  { %1906 = vmatprep.subr.bf16.mxu0 %v1905_v9  ;;  %v1939_v20 = vpack.c.bf16 %v570_v16, %v569_v15  ;;  %v587_v26 = vld [vmem:[#allocation3 + $0x190] sm:$0xff]  ;;  %v588_v27 = vld [vmem:[#allocation3 + $0x198] sm:$0xff]  ;;  %v1911_v28 = vpack.c.bf16 %v540_v25, %v539_v23  ;;  %v557_v32 = vld [vmem:[#allocation3 + $0xa0] sm:$0xff] }
  0x1b   :  { %1908 = vmatpush3.bf16.msra.mxu0 %v1907_v13  ;;  %1938 = vmatprep.subr.bf16.mxu1 %v1937_v19  ;;  %v1941_v29 = vpack.c.bf16 %v588_v27, %v587_v26  ;;  %v571_v30 = vld [vmem:[#allocation3 + $0x110] sm:$0xff]  ;;  %v572_v31 = vld [vmem:[#allocation3 + $0x118] sm:$0xff]  ;;  %v558_v34 = vld [vmem:[#allocation3 + $0xa8] sm:$0xff] }
  0x1c   :  { %1940 = vmatpush3.bf16.msra.mxu1 %v1939_v20  ;;  %1910 = vmatprep.subr.bf16.mxu0 %v1909_v24  ;;  %v1943_v33 = vpack.c.bf16 %v572_v31, %v571_v30  ;;  %v541_v35 = vld [vmem:[#allocation3 + $0x20] sm:$0xff]  ;;  %v542_v36 = vld [vmem:[#allocation3 + $0x28] sm:$0xff]  ;;  %v1913_v38 = vpack.c.bf16 %v558_v34, %v557_v32  ;;  %v559_v44 = vld [vmem:[#allocation3 + $0xb0] sm:$0xff] }
  0x1d   :  { %105 = vperm.xlu1 %2040, %v51_v5   ;;  %102 = vperm.xlu0 %2039, %v50_v6   ;;  %v55_v37 = vld [vmem:[%s2687_s0 + $0x48] sm:$0xff]  ;;  %v589_v39 = vld [vmem:[#allocation3 + $0x1a0] sm:$0xff]  ;;  %v560_v45 = vld [vmem:[#allocation3 + $0xb8] sm:$0xff]  ;;  %v1915_v47 = vpack.c.bf16 %v542_v36, %v541_v35 }
  0x1e   :  { %1942 = vmatprep.subr.bf16.mxu1 %v1941_v29  ;;  %v590_v40 = vld [vmem:[#allocation3 + $0x1a8] sm:$0xff]  ;;  %v573_v41 = vld [vmem:[#allocation3 + $0x120] sm:$0xff]  ;;  %v543_v48 = vld [vmem:[#allocation3 + $0x30] sm:$0xff]  ;;  %v1917_v51 = vpack.c.bf16 %v560_v45, %v559_v44 }
  0x1f   :  { %v1945_v42 = vpack.c.bf16 %v590_v40, %v589_v39  ;;  %v574_v43 = vld [vmem:[#allocation3 + $0x128] sm:$0xff]  ;;  %v54_v46 = vld [vmem:[%s2687_s0 + $0x40] sm:$0xff]  ;;  %1912 = vmatpush3.bf16.msra.mxu0 %v1911_v28  ;;  %v591_v49 = vld [vmem:[#allocation3 + $0x1b0] sm:$0xff] }
  0x20   :  { %1944 = vmatpush3.bf16.msra.mxu1 %v1943_v33  ;;  %1914 = vmatprep.subr.bf16.mxu0 %v1913_v38  ;;  %v1947_v50 = vpack.c.bf16 %v574_v43, %v573_v41  ;;  %v544_v52 = vld [vmem:[#allocation3 + $0x38] sm:$0xff]  ;;  %v575_v54 = vld [vmem:[#allocation3 + $0x130] sm:$0xff]  ;;  %v561_v57 = vld [vmem:[#allocation3 + $0xc0] sm:$0xff] }
  0x21   :  { %111 = vperm.xlu1 %2040, %v53_v17   ;;  %108 = vperm.xlu0 %2039, %v52_v18   ;;  %v592_v53 = vld [vmem:[#allocation3 + $0x1b8] sm:$0xff]  ;;  %v562_v58 = vld [vmem:[#allocation3 + $0xc8] sm:$0xff]  ;;  %v593_v59 = vld [vmem:[#allocation3 + $0x1c0] sm:$0xff]  ;;  %v1919_v63 = vpack.c.bf16 %v544_v52, %v543_v48 }
  0x22   :  { %1946 = vmatprep.subr.bf16.mxu1 %v1945_v42  ;;  %v1949_v55 = vpack.c.bf16 %v592_v53, %v591_v49  ;;  %v576_v56 = vld [vmem:[#allocation3 + $0x138] sm:$0xff]  ;;  %v594_v60 = vld [vmem:[#allocation3 + $0x1c8] sm:$0xff]  ;;  %v56_v62 = vld [vmem:[%s2687_s0 + $0x50] sm:$0xff]  ;;  %v1921_v1 = vpack.c.bf16 %v562_v58, %v561_v57 }
  0x23   :  { %v57_v61 = vld [vmem:[%s2687_s0 + $0x58] sm:$0xff]  ;;  %1916 = vmatpush3.bf16.msra.mxu0 %v1915_v47  ;;  %v1951_v0 = vpack.c.bf16 %v576_v56, %v575_v54  ;;  %v545_v2 = vld [vmem:[#allocation3 + $0x40] sm:$0xff]  ;;  %v546_v3 = vld [vmem:[#allocation3 + $0x48] sm:$0xff]  ;;  %v1953_v5 = vpack.c.bf16 %v594_v60, %v593_v59 }
  0x24   :  { %1948 = vmatpush3.bf16.msra.mxu1 %v1947_v50  ;;  %1918 = vmatprep.subr.bf16.mxu0 %v1917_v51  ;;  %v577_v4 = vld [vmem:[#allocation3 + $0x140] sm:$0xff]  ;;  %v578_v6 = vld [vmem:[#allocation3 + $0x148] sm:$0xff]  ;;  %v563_v7 = vld [vmem:[#allocation3 + $0xd0] sm:$0xff]  ;;  %v1923_v13 = vpack.c.bf16 %v546_v3, %v545_v2 }
  0x25   :  { %117 = vperm.xlu1 %2040, %v55_v37   ;;  %114 = vperm.xlu0 %2039, %v54_v46   ;;  %v564_v8 = vld [vmem:[#allocation3 + $0xd8] sm:$0xff]  ;;  %v595_v9 = vld [vmem:[#allocation3 + $0x1d0] sm:$0xff]  ;;  %v59_v11 = vld [vmem:[%s2687_s0 + $0x68] sm:$0xff]  ;;  %v1955_v14 = vpack.c.bf16 %v578_v6, %v577_v4 }
  0x26   :  { %1950 = vmatprep.subr.bf16.mxu1 %v1949_v55  ;;  %v596_v10 = vld [vmem:[#allocation3 + $0x1d8] sm:$0xff]  ;;  %v58_v12 = vld [vmem:[%s2687_s0 + $0x60] sm:$0xff]  ;;  %v1925_v15 = vpack.c.bf16 %v564_v8, %v563_v7  ;;  %v547_v16 = vld [vmem:[#allocation3 + $0x50] sm:$0xff]  ;;  %v80_v55 = vlaneseq }
  0x27   :  { %1920 = vmatpush3.bf16.msra.mxu0 %v1919_v63  ;;  %v548_v17 = vld [vmem:[#allocation3 + $0x58] sm:$0xff]  ;;  %v579_v18 = vld [vmem:[#allocation3 + $0x150] sm:$0xff]  ;;  %v1957_v19 = vpack.c.bf16 %v596_v10, %v595_v9  ;;  %v565_v21 = vld [vmem:[#allocation3 + $0xe0] sm:$0xff]  ;;  %v2093_v10 = vmov 1.0  }
  0x28   :  { %1952 = vmatpush3.bf16.msra.mxu1 %v1951_v0  ;;  %1922 = vmatprep.subr.bf16.mxu0 %v1921_v1  ;;  %v580_v20 = vld [vmem:[#allocation3 + $0x158] sm:$0xff]  ;;  %v566_v22 = vld [vmem:[#allocation3 + $0xe8] sm:$0xff]  ;;  %v597_v23 = vld [vmem:[#allocation3 + $0x1e0] sm:$0xff]  ;;  %v1927_v27 = vpack.c.bf16 %v548_v17, %v547_v16  ;;  %v2173_v56 = vand.u32 127, %v80_v55 }
  0x29   :  { %123 = vperm.xlu1 %2040, %v57_v61   ;;  %120 = vperm.xlu0 %2039, %v56_v62   ;;  %v598_v24 = vld [vmem:[#allocation3 + $0x1e8] sm:$0xff]  ;;  %v61_v25 = vld [vmem:[%s2687_s0 + $0x78] sm:$0xff]  ;;  %v60_v26 = vld [vmem:[%s2687_s0 + $0x70] sm:$0xff]  ;;  %v1959_v28 = vpack.c.bf16 %v580_v20, %v579_v18  ;;  %v1929_v29 = vpack.c.bf16 %v566_v22, %v565_v21  ;;  %s2094_s0 = smov [#allocation6]  }
  0x2a   :  { %1954 = vmatprep.subr.bf16.mxu1 %v1953_v5  ;;  %v549_v30 = vld [vmem:[#allocation3 + $0x60] sm:$0xff]  ;;  %v550_v31 = vld [vmem:[#allocation3 + $0x68] sm:$0xff]  ;;  %v1961_v33 = vpack.c.bf16 %v598_v24, %v597_v23  ;;  %v567_v35 = vld [vmem:[#allocation3 + $0xf0] sm:$0xff]  ;;  %v2176_v60 = vadd.s32 128, %v2173_v56  ;;  %v2179_v61 = vadd.s32 384, %v2173_v56  ;;  %v2182_v62 = vadd.s32 256, %v2173_v56 }
  0x2b   :  { %1924 = vmatpush3.bf16.msra.mxu0 %v1923_v13  ;;  %v581_v32 = vld [vmem:[#allocation3 + $0x160] sm:$0xff]  ;;  %v582_v34 = vld [vmem:[#allocation3 + $0x168] sm:$0xff]  ;;  %v568_v36 = vld [vmem:[#allocation3 + $0xf8] sm:$0xff]  ;;  %v1931_v39 = vpack.c.bf16 %v550_v31, %v549_v30  ;;  %s1317_s28 = sshll.u32 %s2094_s0, 4  ;;  %s1318_s28 = int_to_ptr.vmem [resolvable:$true] %s1317_s28 }
  0x2c   :  { %1956 = vmatpush3.bf16.msra.mxu1 %v1955_v14  ;;  %1926 = vmatprep.subr.bf16.mxu0 %v1925_v15  ;;  %v599_v37 = vld [vmem:[#allocation3 + $0x1f0] sm:$0xff]  ;;  %v600_v38 = vld [vmem:[#allocation3 + $0x1f8] sm:$0xff]  ;;  %v1963_v40 = vpack.c.bf16 %v582_v34, %v581_v32  ;;  %v1933_v41 = vpack.c.bf16 %v568_v36, %v567_v35  ;;  %v617_v47 = vld [vmem:[#allocation3 + $0x280] sm:$0xff]  ;;  %s2063_s1 = scalar_lea.vmem %s1318_s28, 2048  ;;  %p2068_p9 = scmp.lt.s32.totalorder %s1318_s28, %s1318_s28 }
  0x2d   :  { %129 = vperm.xlu1 %2040, %v59_v11   ;;  %126 = vperm.xlu0 %2039, %v58_v12   ;;  %v551_v42 = vld [vmem:[#allocation3 + $0x70] sm:$0xff]  ;;  %v552_v43 = vld [vmem:[#allocation3 + $0x78] sm:$0xff]  ;;  %v1965_v45 = vpack.c.bf16 %v600_v38, %v599_v37  ;;  %v618_v48 = vld [vmem:[#allocation3 + $0x288] sm:$0xff]  ;;  %p2064_p8 = scmp.ne.s32.totalorder %s1318_s28, %s2063_s1  ;;  %p2069_p10 = scmp.lt.s32.totalorder %s2063_s1, %s2063_s1 }
  0x2e   :  { %1958 = vmatprep.subr.bf16.mxu1 %v1957_v19  ;;  %v583_v44 = vld [vmem:[#allocation3 + $0x170] sm:$0xff]  ;;  %v584_v46 = vld [vmem:[#allocation3 + $0x178] sm:$0xff]  ;;  %v649_v49 = vld [vmem:[#allocation3 + $0x380] sm:$0xff]  ;;  %v1935_v51 = vpack.c.bf16 %v552_v43, %v551_v42  ;;  %v1969_v53 = vpack.c.bf16 %v618_v48, %v617_v47 }
  0x2f   :  { %1928 = vmatpush3.bf16.msra.mxu0 %v1927_v27  ;;  %v650_v50 = vld [vmem:[#allocation3 + $0x388] sm:$0xff]  ;;  %v1967_v52 = vpack.c.bf16 %v584_v46, %v583_v44  ;;  %v601_v57 = vld [vmem:[#allocation3 + $0x200] sm:$0xff]  ;;  %v619_v0 = vld [vmem:[#allocation3 + $0x290] sm:$0xff]  ;;  %p2070_p11 = por %p2069_p10, %p2068_p9 }
  0x30   :  { %1960 = vmatpush3.bf16.msra.mxu1 %v1959_v28  ;;  %1930 = vmatprep.subr.bf16.mxu0 %v1929_v29  ;;  %v2001_v54 = vpack.c.bf16 %v650_v50, %v649_v49  ;;  %v602_v58 = vld [vmem:[#allocation3 + $0x208] sm:$0xff]  ;;  %v633_v59 = vld [vmem:[#allocation3 + $0x300] sm:$0xff]  ;;  %v620_v1 = vld [vmem:[#allocation3 + $0x298] sm:$0xff] }
  0x31   :  { %135 = vperm.xlu1 %2040, %v61_v25   ;;  %132 = vperm.xlu0 %2039, %v60_v26   ;;  %v634_v63 = vld [vmem:[#allocation3 + $0x308] sm:$0xff]  ;;  %v1971_v3 = vpack.c.bf16 %v602_v58, %v601_v57  ;;  %v1973_v5 = vpack.c.bf16 %v620_v1, %v619_v0  ;;  %v603_v6 = vld [vmem:[#allocation3 + $0x210] sm:$0xff]  ;;  %v604_v7 = vld [vmem:[#allocation3 + $0x218] sm:$0xff]  ;;  %p2071_p12 = pnand %p2070_p11, %p2064_p8 }
  0x32   :  { %1962 = vmatprep.subr.bf16.mxu1 %v1961_v33  ;;  %v2003_v4 = vpack.c.bf16 %v634_v63, %v633_v59  ;;  %v651_v8 = vld [vmem:[#allocation3 + $0x390] sm:$0xff]  ;;  %v652_v9 = vld [vmem:[#allocation3 + $0x398] sm:$0xff]  ;;  %v1975_v13 = vpack.c.bf16 %v604_v7, %v603_v6  ;;  %v621_v15 = vld [vmem:[#allocation3 + $0x2a0] sm:$0xff] }
  0x33   :  { %1932 = vmatpush3.bf16.msra.mxu0 %v1931_v39  ;;  %v635_v11 = vld [vmem:[#allocation3 + $0x310] sm:$0xff]  ;;  %v636_v14 = vld [vmem:[#allocation3 + $0x318] sm:$0xff]  ;;  %v622_v16 = vld [vmem:[#allocation3 + $0x2a8] sm:$0xff]  ;;  %v2005_v18 = vpack.c.bf16 %v652_v9, %v651_v8 }
  0x34   :  { %1964 = vmatpush3.bf16.msra.mxu1 %v1963_v40  ;;  %1934 = vmatprep.subr.bf16.mxu0 %v1933_v41  ;;  %v605_v19 = vld [vmem:[#allocation3 + $0x220] sm:$0xff]  ;;  %v606_v20 = vld [vmem:[#allocation3 + $0x228] sm:$0xff]  ;;  %v2007_v21 = vpack.c.bf16 %v636_v14, %v635_v11  ;;  %v1977_v22 = vpack.c.bf16 %v622_v16, %v621_v15  ;;  %v623_v27 = vld [vmem:[#allocation3 + $0x2b0] sm:$0xff] }
  0x35   :  { %1966 = vmatprep.subr.bf16.mxu1 %v1965_v45  ;;  %v653_v23 = vld [vmem:[#allocation3 + $0x3a0] sm:$0xff]  ;;  %v654_v24 = vld [vmem:[#allocation3 + $0x3a8] sm:$0xff]  ;;  %v624_v28 = vld [vmem:[#allocation3 + $0x2b8] sm:$0xff]  ;;  %v1979_v29 = vpack.c.bf16 %v606_v20, %v605_v19 }
  0x36   :  { %v637_v25 = vld [vmem:[#allocation3 + $0x320] sm:$0xff]  ;;  %v638_v26 = vld [vmem:[#allocation3 + $0x328] sm:$0xff]  ;;  %v2009_v30 = vpack.c.bf16 %v654_v24, %v653_v23  ;;  %v607_v31 = vld [vmem:[#allocation3 + $0x230] sm:$0xff]  ;;  %v1981_v36 = vpack.c.bf16 %v624_v28, %v623_v27 }
  0x37   :  { %1936 = vmatpush3.bf16.msra.mxu0 %v1935_v51  ;;  %v608_v32 = vld [vmem:[#allocation3 + $0x238] sm:$0xff]  ;;  %v655_v33 = vld [vmem:[#allocation3 + $0x3b0] sm:$0xff]  ;;  %v2011_v35 = vpack.c.bf16 %v638_v26, %v637_v25  ;;  %v625_v40 = vld [vmem:[#allocation3 + $0x2c0] sm:$0xff] }
  0x38   :  { %1968 = vmatpush3.bf16.msra.mxu1 %v1967_v52  ;;  %1970 = vmatprep.subr.bf16.mxu0 %v1969_v53  ;;  %v656_v37 = vld [vmem:[#allocation3 + $0x3b8] sm:$0xff]  ;;  %v639_v38 = vld [vmem:[#allocation3 + $0x330] sm:$0xff]  ;;  %v626_v41 = vld [vmem:[#allocation3 + $0x2c8] sm:$0xff]  ;;  %v1983_v43 = vpack.c.bf16 %v608_v32, %v607_v31 }
  0x39   :  { %2002 = vmatprep.subr.bf16.mxu1 %v2001_v54  ;;  %v640_v39 = vld [vmem:[#allocation3 + $0x338] sm:$0xff]  ;;  %v2013_v44 = vpack.c.bf16 %v656_v37, %v655_v33  ;;  %v609_v46 = vld [vmem:[#allocation3 + $0x240] sm:$0xff]  ;;  %v610_v47 = vld [vmem:[#allocation3 + $0x248] sm:$0xff]  ;;  %v1985_v49 = vpack.c.bf16 %v626_v41, %v625_v40 }
  0x3a   :  { %v2015_v45 = vpack.c.bf16 %v640_v39, %v639_v38  ;;  %v657_v48 = vld [vmem:[#allocation3 + $0x3c0] sm:$0xff]  ;;  %v658_v50 = vld [vmem:[#allocation3 + $0x3c8] sm:$0xff]  ;;  %v627_v53 = vld [vmem:[#allocation3 + $0x2d0] sm:$0xff]  ;;  %v1987_v57 = vpack.c.bf16 %v610_v47, %v609_v46 }
  0x3b   :  { %v641_v51 = vld [vmem:[#allocation3 + $0x340] sm:$0xff]  ;;  %v642_v52 = vld [vmem:[#allocation3 + $0x348] sm:$0xff]  ;;  %v628_v54 = vld [vmem:[#allocation3 + $0x2d8] sm:$0xff]  ;;  %v2017_v58 = vpack.c.bf16 %v658_v50, %v657_v48  ;;  %v2416_v50 = vadd.s32 896, %v2173_v56 }
  0x3c   :  { %v2019_v59 = vpack.c.bf16 %v642_v52, %v641_v51  ;;  %v611_v63 = vld [vmem:[#allocation3 + $0x250] sm:$0xff]  ;;  %v612_v0 = vld [vmem:[#allocation3 + $0x258] sm:$0xff]  ;;  %v629_v7 = vld [vmem:[#allocation3 + $0x2e0] sm:$0xff] }
  0x3d   :  { %v659_v1 = vld [vmem:[#allocation3 + $0x3d0] sm:$0xff]  ;;  %v644_v6 = vld [vmem:[#allocation3 + $0x358] sm:$0xff]  ;;  %v630_v8 = vld [vmem:[#allocation3 + $0x2e8] sm:$0xff]  ;;  %v1991_v11 = vpack.c.bf16 %v612_v0, %v611_v63 }
  0x3e   :  { %v613_v15 = vld [vmem:[#allocation3 + $0x260] sm:$0xff]  ;;  %v614_v16 = vld [vmem:[#allocation3 + $0x268] sm:$0xff]  ;;  %v1993_v19 = vpack.c.bf16 %v630_v8, %v629_v7  ;;  %v631_v23 = vld [vmem:[#allocation3 + $0x2f0] sm:$0xff] }
  0x3f   :  { %v662_v20 = vld [vmem:[#allocation3 + $0x3e8] sm:$0xff]  ;;  %v632_v24 = vld [vmem:[#allocation3 + $0x2f8] sm:$0xff]  ;;  %v1995_v26 = vpack.c.bf16 %v614_v16, %v613_v15  ;;  %v663_v32 = vld [vmem:[#allocation3 + $0x3f0] sm:$0xff] }
  0x40   :  { %v616_v31 = vld [vmem:[#allocation3 + $0x278] sm:$0xff] }
  0x41   :  { %v664_v33 = vld [vmem:[#allocation3 + $0x3f8] sm:$0xff] }
  0x42   :  { %v2029_v39 = vpack.c.bf16 %v664_v33, %v663_v32 }
  0x94   :  { %v2184_v2 = vpop.permute.xlu0 %90  ;;  %v2196_v12 = vpop.permute.xlu1 %96 }
  0x95   :  { %vm138_vm0 = vcmp.eq.s32.totalorder %v2176_v60, %v2184_v2  ;;  %vm140_vm1 = vcmp.eq.s32.totalorder %v2179_v61, %v2184_v2  ;;  %vm137_vm2 = vcmp.eq.s32.totalorder %v2173_v56, %v2184_v2  ;;  %vm139_vm3 = vcmp.eq.s32.totalorder %v2182_v62, %v2184_v2 }
  0x96   :  { %1457 = vmatprep.mubr.msk.f32.mxu0 %vm138_vm0, %v2093_v10  ;;  %1489 = vmatprep.mubr.msk.f32.mxu1 %vm140_vm1, %v2093_v10  ;;  %vm154_vm4 = vcmp.eq.s32.totalorder %v2176_v60, %v2196_v12  ;;  %vm156_vm5 = vcmp.eq.s32.totalorder %v2179_v61, %v2196_v12  ;;  %vm153_vm10 = vcmp.eq.s32.totalorder %v2173_v56, %v2196_v12 }
  0x97   :  { %1458 = vmatmul.mubr.msk.f32.vlgmr.msra.gmra.mrb[0].mxu0 %vm137_vm2, %v2093_v10  ;;  %1490 = vmatmul.mubr.msk.f32.vlgmr.msra.gmra.mrb[0].mxu1 %vm139_vm3, %v2093_v10  ;;  %vm155_vm11 = vcmp.eq.s32.totalorder %v2182_v62, %v2196_v12 }
  0x98   :  { %1972 = vmatpush3.bf16.msra.mxu0 %v1971_v3  ;;  %v2200_v17 = vpop.permute.xlu0 %93  ;;  %2004 = vmatpush3.bf16.msra.mxu1 %v2003_v4  ;;  %v2230_v34 = vpop.permute.xlu1 %99  ;;  %v1989_v3 = vpack.c.bf16 %v628_v54, %v627_v53  ;;  %v660_v4 = vld [vmem:[#allocation3 + $0x3d8] sm:$0xff] }
  0x99   :  { %vm146_vm6 = vcmp.eq.s32.totalorder %v2176_v60, %v2200_v17  ;;  %vm148_vm7 = vcmp.eq.s32.totalorder %v2179_v61, %v2200_v17  ;;  %vm145_vm8 = vcmp.eq.s32.totalorder %v2173_v56, %v2200_v17  ;;  %vm147_vm9 = vcmp.eq.s32.totalorder %v2182_v62, %v2200_v17  ;;  %1974 = vmatprep.subr.bf16.mxu0 %v1973_v5  ;;  %v643_v5 = vld [vmem:[#allocation3 + $0x350] sm:$0xff] }
  0x9a   :  { %1459 = vmatprep.mubr.msk.f32.mxu0 %vm146_vm6, %v2093_v10  ;;  %1491 = vmatprep.mubr.msk.f32.mxu1 %vm148_vm7, %v2093_v10  ;;  %vm162_vm12 = vcmp.eq.s32.totalorder %v2176_v60, %v2230_v34  ;;  %vm164_vm13 = vcmp.eq.s32.totalorder %v2179_v61, %v2230_v34  ;;  %vm161_vm14 = vcmp.eq.s32.totalorder %v2173_v56, %v2230_v34 }
  0x9b   :  { %1460 = vmatmul.mubr.msk.f32.gmra.mrb[2].mxu0 %vm145_vm8, %v2093_v10  ;;  %1492 = vmatmul.mubr.msk.f32.gmra.mrb[2].mxu1 %vm147_vm9, %v2093_v10  ;;  %vm163_vm15 = vcmp.eq.s32.totalorder %v2182_v62, %v2230_v34  ;;  %v2023_v14 = vpack.c.bf16 %v644_v6, %v643_v5 }
  0x9c   :  { %1461 = vmatprep.mubr.msk.f32.mxu0 %vm154_vm4, %v2093_v10  ;;  %1493 = vmatprep.mubr.msk.f32.mxu1 %vm156_vm5, %v2093_v10  ;;  %v2244_v42 = vpop.permute.xlu0 %102  ;;  %v2258_v55 = vpop.permute.xlu1 %105 }
  0x9d   :  { %1976 = vmatpush3.bf16.msra.mxu0 %v1975_v13  ;;  %2006 = vmatprep.subr.bf16.mxu1 %v2005_v18  ;;  %vm170_vm0 = vcmp.eq.s32.totalorder %v2176_v60, %v2244_v42  ;;  %vm172_vm1 = vcmp.eq.s32.totalorder %v2179_v61, %v2244_v42  ;;  %vm169_vm2 = vcmp.eq.s32.totalorder %v2173_v56, %v2244_v42  ;;  %v661_v18 = vld [vmem:[#allocation3 + $0x3e0] sm:$0xff] }
  0x9e   :  { %2008 = vmatpush3.bf16.msra.mxu1 %v2007_v21  ;;  %1978 = vmatprep.subr.bf16.mxu0 %v1977_v22  ;;  %vm171_vm3 = vcmp.eq.s32.totalorder %v2182_v62, %v2244_v42  ;;  %vm178_vm4 = vcmp.eq.s32.totalorder %v2176_v60, %v2258_v55  ;;  %vm180_vm5 = vcmp.eq.s32.totalorder %v2179_v61, %v2258_v55  ;;  %v645_v21 = vld [vmem:[#allocation3 + $0x360] sm:$0xff]  ;;  %v646_v22 = vld [vmem:[#allocation3 + $0x368] sm:$0xff] }
  0x9f   :  { %1462 = vmatmul.mubr.msk.f32.gmra.mrb[4].mxu0 %vm153_vm10, %v2093_v10  ;;  %1494 = vmatmul.mubr.msk.f32.gmra.mrb[4].mxu1 %vm155_vm11, %v2093_v10  ;;  %v2021_v13 = vpack.c.bf16 %v660_v4, %v659_v1  ;;  %vm177_vm6 = vcmp.eq.s32.totalorder %v2173_v56, %v2258_v55  ;;  %vm179_vm7 = vcmp.eq.s32.totalorder %v2182_v62, %v2258_v55 }
  0xa0   :  { %1463 = vmatprep.mubr.msk.f32.mxu0 %vm162_vm12, %v2093_v10  ;;  %1495 = vmatprep.mubr.msk.f32.mxu1 %vm164_vm13, %v2093_v10  ;;  %v2272_v9 = vpop.permute.xlu0 %108  ;;  %v2286_v25 = vpop.permute.xlu1 %111  ;;  %v2025_v27 = vpack.c.bf16 %v662_v20, %v661_v18  ;;  %v2027_v28 = vpack.c.bf16 %v646_v22, %v645_v21 }
  0xa1   :  { %1980 = vmatpush3.bf16.msra.mxu0 %v1979_v29  ;;  %2010 = vmatprep.subr.bf16.mxu1 %v2009_v30  ;;  %vm186_vm8 = vcmp.eq.s32.totalorder %v2176_v60, %v2272_v9  ;;  %vm188_vm9 = vcmp.eq.s32.totalorder %v2179_v61, %v2272_v9  ;;  %v615_v29 = vld [vmem:[#allocation3 + $0x270] sm:$0xff]  ;;  %vm185_vm10 = vcmp.eq.s32.totalorder %v2173_v56, %v2272_v9 }
  0xa2   :  { %2012 = vmatpush3.bf16.msra.mxu1 %v2011_v35  ;;  %1982 = vmatprep.subr.bf16.mxu0 %v1981_v36  ;;  %vm187_vm11 = vcmp.eq.s32.totalorder %v2182_v62, %v2272_v9  ;;  %v1997_v30 = vpack.c.bf16 %v632_v24, %v631_v23  ;;  %vm194_vm12 = vcmp.eq.s32.totalorder %v2176_v60, %v2286_v25  ;;  %v647_v35 = vld [vmem:[#allocation3 + $0x370] sm:$0xff]  ;;  %v648_v36 = vld [vmem:[#allocation3 + $0x378] sm:$0xff] }
  0xa3   :  { %1464 = vmatmul.mubr.msk.f32.gmra.mrb[6].mxu0 %vm161_vm14, %v2093_v10  ;;  %1496 = vmatmul.mubr.msk.f32.gmra.mrb[6].mxu1 %vm163_vm15, %v2093_v10  ;;  %vm196_vm13 = vcmp.eq.s32.totalorder %v2179_v61, %v2286_v25  ;;  %v1999_v38 = vpack.c.bf16 %v616_v31, %v615_v29  ;;  %vm193_vm14 = vcmp.eq.s32.totalorder %v2173_v56, %v2286_v25 }
  0xa4   :  { %1465 = vmatprep.mubr.msk.f32.mxu0 %vm170_vm0, %v2093_v10  ;;  %1497 = vmatprep.mubr.msk.f32.mxu1 %vm172_vm1, %v2093_v10  ;;  %v2300_v37 = vpop.permute.xlu0 %114  ;;  %vm195_vm15 = vcmp.eq.s32.totalorder %v2182_v62, %v2286_v25  ;;  %v2031_v40 = vpack.c.bf16 %v648_v36, %v647_v35  ;;  %v2314_v41 = vpop.permute.xlu1 %117 }
  0xa5   :  { %1984 = vmatpush3.bf16.msra.mxu0 %v1983_v43  ;;  %2014 = vmatprep.subr.bf16.mxu1 %v2013_v44  ;;  %vm202_vm0 = vcmp.eq.s32.totalorder %v2176_v60, %v2300_v37  ;;  %vm204_vm1 = vcmp.eq.s32.totalorder %v2179_v61, %v2300_v37 }
  0xa6   :  { %2016 = vmatpush3.bf16.msra.mxu1 %v2015_v45  ;;  %1986 = vmatprep.subr.bf16.mxu0 %v1985_v49  ;;  %v2413_v49 = vadd.s32 640, %v2173_v56 }
  0xa7   :  { %1466 = vmatmul.mubr.msk.f32.gmra.mrb[8].mxu0 %vm169_vm2, %v2093_v10  ;;  %1498 = vmatmul.mubr.msk.f32.gmra.mrb[8].mxu1 %vm171_vm3, %v2093_v10  ;;  %vm201_vm2 = vcmp.eq.s32.totalorder %v2173_v56, %v2300_v37  ;;  %vm203_vm3 = vcmp.eq.s32.totalorder %v2182_v62, %v2300_v37 }
  0xa8   :  { %1467 = vmatprep.mubr.msk.f32.mxu0 %vm178_vm4, %v2093_v10  ;;  %1499 = vmatprep.mubr.msk.f32.mxu1 %vm180_vm5, %v2093_v10  ;;  %vm210_vm4 = vcmp.eq.s32.totalorder %v2176_v60, %v2314_v41  ;;  %vm212_vm5 = vcmp.eq.s32.totalorder %v2179_v61, %v2314_v41  ;;  %v2328_v43 = vpop.permute.xlu0 %120  ;;  %v2342_v44 = vpop.permute.xlu1 %123 }
  0xa9   :  { %1988 = vmatpush3.bf16.msra.mxu0 %v1987_v57  ;;  %2018 = vmatprep.subr.bf16.mxu1 %v2017_v58 }
  0xaa   :  { %2020 = vmatpush3.bf16.msra.mxu1 %v2019_v59  ;;  %1990 = vmatprep.subr.bf16.mxu0 %v1989_v3 }
  0xab   :  { %1468 = vmatmul.mubr.msk.f32.gmra.mrb[10].mxu0 %vm177_vm6, %v2093_v10  ;;  %1500 = vmatmul.mubr.msk.f32.gmra.mrb[10].mxu1 %vm179_vm7, %v2093_v10  ;;  %vm209_vm6 = vcmp.eq.s32.totalorder %v2173_v56, %v2314_v41  ;;  %vm211_vm7 = vcmp.eq.s32.totalorder %v2182_v62, %v2314_v41 }
  0xac   :  { %1469 = vmatprep.mubr.msk.f32.mxu0 %vm186_vm8, %v2093_v10  ;;  %1501 = vmatprep.mubr.msk.f32.mxu1 %vm188_vm9, %v2093_v10  ;;  %vm218_vm8 = vcmp.eq.s32.totalorder %v2176_v60, %v2328_v43  ;;  %vm220_vm9 = vcmp.eq.s32.totalorder %v2179_v61, %v2328_v43  ;;  %v2356_v45 = vpop.permute.xlu0 %126  ;;  %v2370_v46 = vpop.permute.xlu1 %129 }
  0xad   :  { %1992 = vmatpush3.bf16.msra.mxu0 %v1991_v11  ;;  %2022 = vmatprep.subr.bf16.mxu1 %v2021_v13 }
  0xae   :  { %2024 = vmatpush3.bf16.msra.mxu1 %v2023_v14  ;;  %1994 = vmatprep.subr.bf16.mxu0 %v1993_v19 }
  0xaf   :  { %1470 = vmatmul.mubr.msk.f32.gmra.mrb[12].mxu0 %vm185_vm10, %v2093_v10  ;;  %1502 = vmatmul.mubr.msk.f32.gmra.mrb[12].mxu1 %vm187_vm11, %v2093_v10  ;;  %vm217_vm10 = vcmp.eq.s32.totalorder %v2173_v56, %v2328_v43  ;;  %vm219_vm11 = vcmp.eq.s32.totalorder %v2182_v62, %v2328_v43 }
  0xb0   :  { %1471 = vmatprep.mubr.msk.f32.mxu0 %vm194_vm12, %v2093_v10  ;;  %1503 = vmatprep.mubr.msk.f32.mxu1 %vm196_vm13, %v2093_v10  ;;  %vm226_vm12 = vcmp.eq.s32.totalorder %v2176_v60, %v2342_v44  ;;  %vm228_vm13 = vcmp.eq.s32.totalorder %v2179_v61, %v2342_v44  ;;  %v2384_v47 = vpop.permute.xlu0 %132  ;;  %v2398_v48 = vpop.permute.xlu1 %135 }
  0xb1   :  { %1996 = vmatpush3.bf16.msra.mxu0 %v1995_v26  ;;  %2026 = vmatprep.subr.bf16.mxu1 %v2025_v27 }
  0xb2   :  { %2028 = vmatpush3.bf16.msra.mxu1 %v2027_v28  ;;  %1998 = vmatprep.subr.bf16.mxu0 %v1997_v30 }
  0xb3   :  { %1472 = vmatmul.mubr.msk.f32.gmra.mrb[14].mxu0 %vm193_vm14, %v2093_v10  ;;  %1504 = vmatmul.mubr.msk.f32.gmra.mrb[14].mxu1 %vm195_vm15, %v2093_v10  ;;  %vm225_vm14 = vcmp.eq.s32.totalorder %v2173_v56, %v2342_v44  ;;  %vm227_vm15 = vcmp.eq.s32.totalorder %v2182_v62, %v2342_v44 }
  0xb4   :  { %1473 = vmatprep.mubr.msk.f32.mxu0 %vm202_vm0, %v2093_v10  ;;  %1505 = vmatprep.mubr.msk.f32.mxu1 %vm204_vm1, %v2093_v10  ;;  %vm234_vm0 = vcmp.eq.s32.totalorder %v2176_v60, %v2356_v45  ;;  %vm236_vm1 = vcmp.eq.s32.totalorder %v2179_v61, %v2356_v45 }
  0xb5   :  { %2000 = vmatpush3.bf16.msra.mxu0 %v1999_v38  ;;  %2030 = vmatprep.subr.bf16.mxu1 %v2029_v39 }
  0xb6   :  { %2032 = vmatpush3.bf16.msra.mxu1 %v2031_v40 }
  0xb7   :  { %1474 = vmatmul.mubr.msk.f32.gmra.mrb[16].mxu0 %vm201_vm2, %v2093_v10  ;;  %1506 = vmatmul.mubr.msk.f32.gmra.mrb[16].mxu1 %vm203_vm3, %v2093_v10  ;;  %vm233_vm2 = vcmp.eq.s32.totalorder %v2173_v56, %v2356_v45  ;;  %vm235_vm3 = vcmp.eq.s32.totalorder %v2182_v62, %v2356_v45 }
  0xb8   :  { %1475 = vmatprep.mubr.msk.f32.mxu0 %vm210_vm4, %v2093_v10  ;;  %1507 = vmatprep.mubr.msk.f32.mxu1 %vm212_vm5, %v2093_v10  ;;  %vm242_vm4 = vcmp.eq.s32.totalorder %v2176_v60, %v2370_v46  ;;  %vm244_vm5 = vcmp.eq.s32.totalorder %v2179_v61, %v2370_v46 }
  0xbb   :  { %1476 = vmatmul.mubr.msk.f32.gmra.mrb[18].mxu0 %vm209_vm6, %v2093_v10  ;;  %1508 = vmatmul.mubr.msk.f32.gmra.mrb[18].mxu1 %vm211_vm7, %v2093_v10  ;;  %vm241_vm6 = vcmp.eq.s32.totalorder %v2173_v56, %v2370_v46  ;;  %vm243_vm7 = vcmp.eq.s32.totalorder %v2182_v62, %v2370_v46 }
  0xbc   :  { %1477 = vmatprep.mubr.msk.f32.mxu0 %vm218_vm8, %v2093_v10  ;;  %1509 = vmatprep.mubr.msk.f32.mxu1 %vm220_vm9, %v2093_v10  ;;  %vm250_vm8 = vcmp.eq.s32.totalorder %v2176_v60, %v2384_v47  ;;  %vm252_vm9 = vcmp.eq.s32.totalorder %v2179_v61, %v2384_v47 }
  0xbf   :  { %1478 = vmatmul.mubr.msk.f32.gmra.mrb[20].mxu0 %vm217_vm10, %v2093_v10  ;;  %1510 = vmatmul.mubr.msk.f32.gmra.mrb[20].mxu1 %vm219_vm11, %v2093_v10  ;;  %vm249_vm10 = vcmp.eq.s32.totalorder %v2173_v56, %v2384_v47  ;;  %vm251_vm11 = vcmp.eq.s32.totalorder %v2182_v62, %v2384_v47 }
  0xc0   :  { %1479 = vmatprep.mubr.msk.f32.mxu0 %vm226_vm12, %v2093_v10  ;;  %1511 = vmatprep.mubr.msk.f32.mxu1 %vm228_vm13, %v2093_v10  ;;  %vm258_vm12 = vcmp.eq.s32.totalorder %v2176_v60, %v2398_v48  ;;  %vm260_vm13 = vcmp.eq.s32.totalorder %v2179_v61, %v2398_v48  ;;  %v2425_v60 = vadd.s32 512, %v2173_v56  ;;  %v2428_v61 = vadd.s32 768, %v2173_v56 }
  0xc3   :  { %1480 = vmatmul.mubr.msk.f32.gmra.mrb[22].mxu0 %vm225_vm14, %v2093_v10  ;;  %1512 = vmatmul.mubr.msk.f32.gmra.mrb[22].mxu1 %vm227_vm15, %v2093_v10  ;;  %vm257_vm14 = vcmp.eq.s32.totalorder %v2173_v56, %v2398_v48  ;;  %vm259_vm15 = vcmp.eq.s32.totalorder %v2182_v62, %v2398_v48 }
  0xc4   :  { %1481 = vmatprep.mubr.msk.f32.mxu0 %vm234_vm0, %v2093_v10  ;;  %1513 = vmatprep.mubr.msk.f32.mxu1 %vm236_vm1, %v2093_v10  ;;  %vm142_vm0 = vcmp.eq.s32.totalorder %v2413_v49, %v2184_v2  ;;  %vm144_vm1 = vcmp.eq.s32.totalorder %v2416_v50, %v2184_v2 }
  0xc7   :  { %1482 = vmatmul.mubr.msk.f32.gmra.mrb[24].mxu0 %vm233_vm2, %v2093_v10  ;;  %1514 = vmatmul.mubr.msk.f32.gmra.mrb[24].mxu1 %vm235_vm3, %v2093_v10  ;;  %vm141_vm2 = vcmp.eq.s32.totalorder %v2425_v60, %v2184_v2  ;;  %vm143_vm3 = vcmp.eq.s32.totalorder %v2428_v61, %v2184_v2 }
  0xc8   :  { %1483 = vmatprep.mubr.msk.f32.mxu0 %vm242_vm4, %v2093_v10  ;;  %1515 = vmatprep.mubr.msk.f32.mxu1 %vm244_vm5, %v2093_v10  ;;  %vm150_vm4 = vcmp.eq.s32.totalorder %v2413_v49, %v2200_v17  ;;  %vm152_vm5 = vcmp.eq.s32.totalorder %v2416_v50, %v2200_v17 }
  0xcb   :  { %1484 = vmatmul.mubr.msk.f32.gmra.mrb[26].mxu0 %vm241_vm6, %v2093_v10  ;;  %1516 = vmatmul.mubr.msk.f32.gmra.mrb[26].mxu1 %vm243_vm7, %v2093_v10  ;;  %vm149_vm6 = vcmp.eq.s32.totalorder %v2425_v60, %v2200_v17  ;;  %vm151_vm7 = vcmp.eq.s32.totalorder %v2428_v61, %v2200_v17 }
  0xcc   :  { %1485 = vmatprep.mubr.msk.f32.mxu0 %vm250_vm8, %v2093_v10  ;;  %1517 = vmatprep.mubr.msk.f32.mxu1 %vm252_vm9, %v2093_v10  ;;  %vm158_vm8 = vcmp.eq.s32.totalorder %v2413_v49, %v2196_v12  ;;  %vm160_vm9 = vcmp.eq.s32.totalorder %v2416_v50, %v2196_v12 }
  0xcf   :  { %1486 = vmatmul.mubr.msk.f32.gmra.mrb[28].mxu0 %vm249_vm10, %v2093_v10  ;;  %1518 = vmatmul.mubr.msk.f32.gmra.mrb[28].mxu1 %vm251_vm11, %v2093_v10  ;;  %vm157_vm10 = vcmp.eq.s32.totalorder %v2425_v60, %v2196_v12  ;;  %vm159_vm11 = vcmp.eq.s32.totalorder %v2428_v61, %v2196_v12 }
  0xd0   :  { %1487 = vmatprep.mubr.msk.f32.mxu0 %vm258_vm12, %v2093_v10  ;;  %1519 = vmatprep.mubr.msk.f32.mxu1 %vm260_vm13, %v2093_v10  ;;  %vm166_vm12 = vcmp.eq.s32.totalorder %v2413_v49, %v2230_v34  ;;  %vm168_vm13 = vcmp.eq.s32.totalorder %v2416_v50, %v2230_v34 }
  0xd3   :  { %1488 = vmatmul.mubr.msk.f32.gmra.mrb[30].mxu0 %vm257_vm14, %v2093_v10  ;;  %1520 = vmatmul.mubr.msk.f32.gmra.mrb[30].mxu1 %vm259_vm15, %v2093_v10  ;;  %vm165_vm14 = vcmp.eq.s32.totalorder %v2425_v60, %v2230_v34  ;;  %vm167_vm15 = vcmp.eq.s32.totalorder %v2428_v61, %v2230_v34 }
  0xd4   :  { %1521 = vmatprep.mubr.msk.f32.mxu0 %vm142_vm0, %v2093_v10  ;;  %1553 = vmatprep.mubr.msk.f32.mxu1 %vm144_vm1, %v2093_v10  ;;  %vm174_vm0 = vcmp.eq.s32.totalorder %v2413_v49, %v2244_v42  ;;  %vm176_vm1 = vcmp.eq.s32.totalorder %v2416_v50, %v2244_v42 }
  0xd7   :  { %1522 = vmatmul.mubr.msk.f32.vlgmr.msra.gmra.mrb[32].mxu0 %vm141_vm2, %v2093_v10  ;;  %1554 = vmatmul.mubr.msk.f32.vlgmr.msra.gmra.mrb[32].mxu1 %vm143_vm3, %v2093_v10  ;;  %vm173_vm2 = vcmp.eq.s32.totalorder %v2425_v60, %v2244_v42  ;;  %vm175_vm3 = vcmp.eq.s32.totalorder %v2428_v61, %v2244_v42 }
  0xd8   :  { %1523 = vmatprep.mubr.msk.f32.mxu0 %vm150_vm4, %v2093_v10  ;;  %1555 = vmatprep.mubr.msk.f32.mxu1 %vm152_vm5, %v2093_v10  ;;  %vm182_vm4 = vcmp.eq.s32.totalorder %v2413_v49, %v2258_v55  ;;  %vm184_vm5 = vcmp.eq.s32.totalorder %v2416_v50, %v2258_v55 }
  0xdb   :  { %1524 = vmatmul.mubr.msk.f32.gmra.mrb[34].mxu0 %vm149_vm6, %v2093_v10  ;;  %1556 = vmatmul.mubr.msk.f32.gmra.mrb[34].mxu1 %vm151_vm7, %v2093_v10  ;;  %vm181_vm6 = vcmp.eq.s32.totalorder %v2425_v60, %v2258_v55  ;;  %vm183_vm7 = vcmp.eq.s32.totalorder %v2428_v61, %v2258_v55 }
  0xdc   :  { %1525 = vmatprep.mubr.msk.f32.mxu0 %vm158_vm8, %v2093_v10  ;;  %1557 = vmatprep.mubr.msk.f32.mxu1 %vm160_vm9, %v2093_v10  ;;  %vm190_vm8 = vcmp.eq.s32.totalorder %v2413_v49, %v2272_v9  ;;  %vm192_vm9 = vcmp.eq.s32.totalorder %v2416_v50, %v2272_v9 }
  0xdf   :  { %1526 = vmatmul.mubr.msk.f32.gmra.mrb[36].mxu0 %vm157_vm10, %v2093_v10  ;;  %1558 = vmatmul.mubr.msk.f32.gmra.mrb[36].mxu1 %vm159_vm11, %v2093_v10  ;;  %vm189_vm10 = vcmp.eq.s32.totalorder %v2425_v60, %v2272_v9  ;;  %vm191_vm11 = vcmp.eq.s32.totalorder %v2428_v61, %v2272_v9 }
  0xe0   :  { %1527 = vmatprep.mubr.msk.f32.mxu0 %vm166_vm12, %v2093_v10  ;;  %1559 = vmatprep.mubr.msk.f32.mxu1 %vm168_vm13, %v2093_v10  ;;  %vm198_vm12 = vcmp.eq.s32.totalorder %v2413_v49, %v2286_v25  ;;  %vm200_vm13 = vcmp.eq.s32.totalorder %v2416_v50, %v2286_v25 }
  0xe3   :  { %1528 = vmatmul.mubr.msk.f32.gmra.mrb[38].mxu0 %vm165_vm14, %v2093_v10  ;;  %1560 = vmatmul.mubr.msk.f32.gmra.mrb[38].mxu1 %vm167_vm15, %v2093_v10  ;;  %vm197_vm14 = vcmp.eq.s32.totalorder %v2425_v60, %v2286_v25  ;;  %vm199_vm15 = vcmp.eq.s32.totalorder %v2428_v61, %v2286_v25 }
  0xe4   :  { %1529 = vmatprep.mubr.msk.f32.mxu0 %vm174_vm0, %v2093_v10  ;;  %1561 = vmatprep.mubr.msk.f32.mxu1 %vm176_vm1, %v2093_v10  ;;  %vm206_vm0 = vcmp.eq.s32.totalorder %v2413_v49, %v2300_v37  ;;  %vm208_vm1 = vcmp.eq.s32.totalorder %v2416_v50, %v2300_v37 }
  0xe7   :  { %1530 = vmatmul.mubr.msk.f32.gmra.mrb[40].mxu0 %vm173_vm2, %v2093_v10  ;;  %1562 = vmatmul.mubr.msk.f32.gmra.mrb[40].mxu1 %vm175_vm3, %v2093_v10  ;;  %vm205_vm2 = vcmp.eq.s32.totalorder %v2425_v60, %v2300_v37  ;;  %vm207_vm3 = vcmp.eq.s32.totalorder %v2428_v61, %v2300_v37 }
  0xe8   :  { %1531 = vmatprep.mubr.msk.f32.mxu0 %vm182_vm4, %v2093_v10  ;;  %1563 = vmatprep.mubr.msk.f32.mxu1 %vm184_vm5, %v2093_v10  ;;  %vm214_vm4 = vcmp.eq.s32.totalorder %v2413_v49, %v2314_v41  ;;  %vm216_vm5 = vcmp.eq.s32.totalorder %v2416_v50, %v2314_v41 }
  0xeb   :  { %1532 = vmatmul.mubr.msk.f32.gmra.mrb[42].mxu0 %vm181_vm6, %v2093_v10  ;;  %1564 = vmatmul.mubr.msk.f32.gmra.mrb[42].mxu1 %vm183_vm7, %v2093_v10  ;;  %vm213_vm6 = vcmp.eq.s32.totalorder %v2425_v60, %v2314_v41  ;;  %vm215_vm7 = vcmp.eq.s32.totalorder %v2428_v61, %v2314_v41 }
  0xec   :  { %1533 = vmatprep.mubr.msk.f32.mxu0 %vm190_vm8, %v2093_v10  ;;  %1565 = vmatprep.mubr.msk.f32.mxu1 %vm192_vm9, %v2093_v10  ;;  %vm222_vm8 = vcmp.eq.s32.totalorder %v2413_v49, %v2328_v43  ;;  %vm224_vm9 = vcmp.eq.s32.totalorder %v2416_v50, %v2328_v43 }
  0xef   :  { %1534 = vmatmul.mubr.msk.f32.gmra.mrb[44].mxu0 %vm189_vm10, %v2093_v10  ;;  %1566 = vmatmul.mubr.msk.f32.gmra.mrb[44].mxu1 %vm191_vm11, %v2093_v10  ;;  %vm221_vm10 = vcmp.eq.s32.totalorder %v2425_v60, %v2328_v43  ;;  %vm223_vm11 = vcmp.eq.s32.totalorder %v2428_v61, %v2328_v43 }
  0xf0   :  { %1535 = vmatprep.mubr.msk.f32.mxu0 %vm198_vm12, %v2093_v10  ;;  %1567 = vmatprep.mubr.msk.f32.mxu1 %vm200_vm13, %v2093_v10  ;;  %vm230_vm12 = vcmp.eq.s32.totalorder %v2413_v49, %v2342_v44  ;;  %vm232_vm13 = vcmp.eq.s32.totalorder %v2416_v50, %v2342_v44 }
  0xf3   :  { %1536 = vmatmul.mubr.msk.f32.gmra.mrb[46].mxu0 %vm197_vm14, %v2093_v10  ;;  %1568 = vmatmul.mubr.msk.f32.gmra.mrb[46].mxu1 %vm199_vm15, %v2093_v10  ;;  %vm229_vm14 = vcmp.eq.s32.totalorder %v2425_v60, %v2342_v44  ;;  %vm231_vm15 = vcmp.eq.s32.totalorder %v2428_v61, %v2342_v44 }
  0xf4   :  { %1537 = vmatprep.mubr.msk.f32.mxu0 %vm206_vm0, %v2093_v10  ;;  %1569 = vmatprep.mubr.msk.f32.mxu1 %vm208_vm1, %v2093_v10  ;;  %vm238_vm0 = vcmp.eq.s32.totalorder %v2413_v49, %v2356_v45  ;;  %vm240_vm1 = vcmp.eq.s32.totalorder %v2416_v50, %v2356_v45 }
  0xf7   :  { %1538 = vmatmul.mubr.msk.f32.gmra.mrb[48].mxu0 %vm205_vm2, %v2093_v10  ;;  %1570 = vmatmul.mubr.msk.f32.gmra.mrb[48].mxu1 %vm207_vm3, %v2093_v10  ;;  %vm237_vm2 = vcmp.eq.s32.totalorder %v2425_v60, %v2356_v45  ;;  %vm239_vm3 = vcmp.eq.s32.totalorder %v2428_v61, %v2356_v45 }
  0xf8   :  { %1539 = vmatprep.mubr.msk.f32.mxu0 %vm214_vm4, %v2093_v10  ;;  %1571 = vmatprep.mubr.msk.f32.mxu1 %vm216_vm5, %v2093_v10  ;;  %vm246_vm4 = vcmp.eq.s32.totalorder %v2413_v49, %v2370_v46  ;;  %vm248_vm5 = vcmp.eq.s32.totalorder %v2416_v50, %v2370_v46 }
  0xfb   :  { %1540 = vmatmul.mubr.msk.f32.gmra.mrb[50].mxu0 %vm213_vm6, %v2093_v10  ;;  %1572 = vmatmul.mubr.msk.f32.gmra.mrb[50].mxu1 %vm215_vm7, %v2093_v10  ;;  %vm245_vm6 = vcmp.eq.s32.totalorder %v2425_v60, %v2370_v46  ;;  %vm247_vm7 = vcmp.eq.s32.totalorder %v2428_v61, %v2370_v46 }
  0xfc   :  { %1541 = vmatprep.mubr.msk.f32.mxu0 %vm222_vm8, %v2093_v10  ;;  %1573 = vmatprep.mubr.msk.f32.mxu1 %vm224_vm9, %v2093_v10  ;;  %vm254_vm8 = vcmp.eq.s32.totalorder %v2413_v49, %v2384_v47  ;;  %vm256_vm9 = vcmp.eq.s32.totalorder %v2416_v50, %v2384_v47 }
  0xff   :  { %1542 = vmatmul.mubr.msk.f32.gmra.mrb[52].mxu0 %vm221_vm10, %v2093_v10  ;;  %1574 = vmatmul.mubr.msk.f32.gmra.mrb[52].mxu1 %vm223_vm11, %v2093_v10  ;;  %vm253_vm10 = vcmp.eq.s32.totalorder %v2425_v60, %v2384_v47  ;;  %vm255_vm11 = vcmp.eq.s32.totalorder %v2428_v61, %v2384_v47 }
 0x100   :  { %1543 = vmatprep.mubr.msk.f32.mxu0 %vm230_vm12, %v2093_v10  ;;  %1575 = vmatprep.mubr.msk.f32.mxu1 %vm232_vm13, %v2093_v10  ;;  %vm262_vm12 = vcmp.eq.s32.totalorder %v2413_v49, %v2398_v48  ;;  %vm264_vm13 = vcmp.eq.s32.totalorder %v2416_v50, %v2398_v48 }
 0x103   :  { %1544 = vmatmul.mubr.msk.f32.gmra.mrb[54].mxu0 %vm229_vm14, %v2093_v10  ;;  %1576 = vmatmul.mubr.msk.f32.gmra.mrb[54].mxu1 %vm231_vm15, %v2093_v10  ;;  %vm261_vm14 = vcmp.eq.s32.totalorder %v2425_v60, %v2398_v48  ;;  %vm263_vm15 = vcmp.eq.s32.totalorder %v2428_v61, %v2398_v48 }
 0x104   :  { %1545 = vmatprep.mubr.msk.f32.mxu0 %vm238_vm0, %v2093_v10  ;;  %1577 = vmatprep.mubr.msk.f32.mxu1 %vm240_vm1, %v2093_v10 }
 0x107   :  { %1546 = vmatmul.mubr.msk.f32.gmra.mrb[56].mxu0 %vm237_vm2, %v2093_v10  ;;  %1578 = vmatmul.mubr.msk.f32.gmra.mrb[56].mxu1 %vm239_vm3, %v2093_v10 }
 0x108   :  { %1547 = vmatprep.mubr.msk.f32.mxu0 %vm246_vm4, %v2093_v10  ;;  %1579 = vmatprep.mubr.msk.f32.mxu1 %vm248_vm5, %v2093_v10 }
 0x10b   :  { %1548 = vmatmul.mubr.msk.f32.gmra.mrb[58].mxu0 %vm245_vm6, %v2093_v10  ;;  %1580 = vmatmul.mubr.msk.f32.gmra.mrb[58].mxu1 %vm247_vm7, %v2093_v10 }
 0x10c   :  { %1549 = vmatprep.mubr.msk.f32.mxu0 %vm254_vm8, %v2093_v10  ;;  %1581 = vmatprep.mubr.msk.f32.mxu1 %vm256_vm9, %v2093_v10 }
 0x10f   :  { %1550 = vmatmul.mubr.msk.f32.gmra.mrb[60].mxu0 %vm253_vm10, %v2093_v10  ;;  %1582 = vmatmul.mubr.msk.f32.gmra.mrb[60].mxu1 %vm255_vm11, %v2093_v10 }
 0x110   :  { %1551 = vmatprep.mubr.msk.f32.mxu0 %vm262_vm12, %v2093_v10  ;;  %1583 = vmatprep.mubr.msk.f32.mxu1 %vm264_vm13, %v2093_v10 }
 0x113   :  { %1552 = vmatmul.mubr.msk.f32.gmra.mrb[62].mxu0 %vm261_vm14, %v2093_v10  ;;  %1584 = vmatmul.mubr.msk.f32.gmra.mrb[62].mxu1 %vm263_vm15, %v2093_v10 }
 0x16a   :  { %v1617_v56 = vpop.f32.mrb[0].mxu0  ;;  %v1697_v62 = vpop.f32.mrb[0].mxu1 }
 0x16b   :  { %v1618_v2 = vpop.f32.mrb[1].mxu0  ;;  %v1698_v12 = vpop.f32.mrb[1].mxu1 }
 0x16c   :  { %v1619_v17 = vadd.f32 %v1618_v2, %v1617_v56  ;;  %v1699_v34 = vadd.f32 %v1698_v12, %v1697_v62 }
 0x16e   :  { %v2624_v42 = vadd.f32 %v1699_v34, %v1619_v17  ;;  %v1620_v51 = vpop.f32.mrb[2].mxu0  ;;  %v1700_v52 = vpop.f32.mrb[2].mxu1 }
 0x16f   :  { %v1621_v53 = vpop.f32.mrb[3].mxu0  ;;  %v1701_v54 = vpop.f32.mrb[3].mxu1 }
 0x170   :  { %v1622_v55 = vadd.f32 %v1621_v53, %v1620_v51  ;;  %v1702_v57 = vadd.f32 %v1701_v54, %v1700_v52 }
 0x172   :  { %v2626_v58 = vadd.f32 %v1702_v57, %v1622_v55  ;;  %v1623_v59 = vpop.f32.mrb[4].mxu0  ;;  %v1703_v63 = vpop.f32.mrb[4].mxu1 }
 0x173   :  { %v1624_v0 = vpop.f32.mrb[5].mxu0  ;;  %v1704_v10 = vpop.f32.mrb[5].mxu1 }
 0x174   :  { %v1625_v1 = vadd.f32 %v1624_v0, %v1623_v59  ;;  %v1705_v3 = vadd.f32 %v1704_v10, %v1703_v63 }
 0x176   :  { %v2628_v4 = vadd.f32 %v1705_v3, %v1625_v1  ;;  %v1626_v5 = vpop.f32.mrb[6].mxu0  ;;  %v1706_v6 = vpop.f32.mrb[6].mxu1 }
 0x177   :  { %v1627_v7 = vpop.f32.mrb[7].mxu0  ;;  %v1707_v8 = vpop.f32.mrb[7].mxu1 }
 0x178   :  { %v1628_v9 = vadd.f32 %v1627_v7, %v1626_v5  ;;  %v1708_v11 = vadd.f32 %v1707_v8, %v1706_v6 }
 0x17a   :  { %v2630_v13 = vadd.f32 %v1708_v11, %v1628_v9  ;;  %v1629_v14 = vpop.f32.mrb[8].mxu0  ;;  %v1709_v15 = vpop.f32.mrb[8].mxu1 }
 0x17b   :  { %v1630_v16 = vpop.f32.mrb[9].mxu0  ;;  %v1710_v18 = vpop.f32.mrb[9].mxu1 }
 0x17c   :  { %v1631_v19 = vadd.f32 %v1630_v16, %v1629_v14  ;;  %v1711_v20 = vadd.f32 %v1710_v18, %v1709_v15 }
 0x17e   :  { %v2632_v21 = vadd.f32 %v1711_v20, %v1631_v19  ;;  %v1632_v22 = vpop.f32.mrb[10].mxu0  ;;  %v1712_v23 = vpop.f32.mrb[10].mxu1 }
 0x17f   :  { %v1633_v24 = vpop.f32.mrb[11].mxu0  ;;  %v1713_v25 = vpop.f32.mrb[11].mxu1 }
 0x180   :  { %v1634_v26 = vadd.f32 %v1633_v24, %v1632_v22  ;;  %v1714_v27 = vadd.f32 %v1713_v25, %v1712_v23 }
 0x182   :  { %v2634_v28 = vadd.f32 %v1714_v27, %v1634_v26  ;;  %v1635_v29 = vpop.f32.mrb[12].mxu0  ;;  %v1715_v30 = vpop.f32.mrb[12].mxu1 }
 0x183   :  { %v1636_v31 = vpop.f32.mrb[13].mxu0  ;;  %v1716_v32 = vpop.f32.mrb[13].mxu1 }
 0x184   :  { %v1637_v33 = vadd.f32 %v1636_v31, %v1635_v29  ;;  %v1717_v35 = vadd.f32 %v1716_v32, %v1715_v30 }
 0x186   :  { %v2636_v36 = vadd.f32 %v1717_v35, %v1637_v33  ;;  %v1638_v37 = vpop.f32.mrb[14].mxu0  ;;  %v1718_v38 = vpop.f32.mrb[14].mxu1 }
 0x187   :  { %v1639_v39 = vpop.f32.mrb[15].mxu0  ;;  %v1719_v40 = vpop.f32.mrb[15].mxu1 }
 0x188   :  { %v1640_v41 = vadd.f32 %v1639_v39, %v1638_v37  ;;  %v1720_v43 = vadd.f32 %v1719_v40, %v1718_v38 }
 0x18a   :  { %v2638_v44 = vadd.f32 %v1720_v43, %v1640_v41  ;;  %v1641_v45 = vpop.f32.mrb[16].mxu0  ;;  %v1721_v46 = vpop.f32.mrb[16].mxu1 }
 0x18b   :  { %v1642_v47 = vpop.f32.mrb[17].mxu0  ;;  %v1722_v48 = vpop.f32.mrb[17].mxu1 }
 0x18c   :  { %v1643_v49 = vadd.f32 %v1642_v47, %v1641_v45  ;;  %v1723_v50 = vadd.f32 %v1722_v48, %v1721_v46 }
 0x18e   :  { %v2640_v60 = vadd.f32 %v1723_v50, %v1643_v49  ;;  %v1644_v61 = vpop.f32.mrb[18].mxu0  ;;  %v1724_v56 = vpop.f32.mrb[18].mxu1 }
 0x18f   :  { %v1645_v62 = vpop.f32.mrb[19].mxu0  ;;  %v1725_v2 = vpop.f32.mrb[19].mxu1 }
 0x190   :  { %v1646_v12 = vadd.f32 %v1645_v62, %v1644_v61  ;;  %v1726_v17 = vadd.f32 %v1725_v2, %v1724_v56 }
 0x192   :  { %v2642_v34 = vadd.f32 %v1726_v17, %v1646_v12  ;;  %v1647_v51 = vpop.f32.mrb[20].mxu0  ;;  %v1727_v52 = vpop.f32.mrb[20].mxu1 }
 0x193   :  { %v1648_v53 = vpop.f32.mrb[21].mxu0  ;;  %v1728_v54 = vpop.f32.mrb[21].mxu1 }
 0x194   :  { %v1649_v55 = vadd.f32 %v1648_v53, %v1647_v51  ;;  %v1729_v57 = vadd.f32 %v1728_v54, %v1727_v52 }
 0x196   :  { %v2644_v59 = vadd.f32 %v1729_v57, %v1649_v55  ;;  %v1650_v63 = vpop.f32.mrb[22].mxu0  ;;  %v1730_v0 = vpop.f32.mrb[22].mxu1 }
 0x197   :  { %v1651_v10 = vpop.f32.mrb[23].mxu0  ;;  %v1731_v1 = vpop.f32.mrb[23].mxu1 }
 0x198   :  { %v1652_v3 = vadd.f32 %v1651_v10, %v1650_v63  ;;  %v1732_v5 = vadd.f32 %v1731_v1, %v1730_v0 }
 0x19a   :  { %v2646_v6 = vadd.f32 %v1732_v5, %v1652_v3  ;;  %v1653_v7 = vpop.f32.mrb[24].mxu0  ;;  %v1733_v8 = vpop.f32.mrb[24].mxu1 }
 0x19b   :  { %v1654_v9 = vpop.f32.mrb[25].mxu0  ;;  %v1734_v11 = vpop.f32.mrb[25].mxu1 }
 0x19c   :  { %v1655_v14 = vadd.f32 %v1654_v9, %v1653_v7  ;;  %v1735_v15 = vadd.f32 %v1734_v11, %v1733_v8 }
 0x19e   :  { %v2648_v16 = vadd.f32 %v1735_v15, %v1655_v14  ;;  %v1656_v18 = vpop.f32.mrb[26].mxu0  ;;  %v1736_v19 = vpop.f32.mrb[26].mxu1 }
 0x19f   :  { %v1657_v20 = vpop.f32.mrb[27].mxu0  ;;  %v1737_v22 = vpop.f32.mrb[27].mxu1 }
 0x1a0   :  { %v1658_v23 = vadd.f32 %v1657_v20, %v1656_v18  ;;  %v1738_v24 = vadd.f32 %v1737_v22, %v1736_v19 }
 0x1a2   :  { %v2650_v25 = vadd.f32 %v1738_v24, %v1658_v23  ;;  %v1659_v26 = vpop.f32.mrb[28].mxu0  ;;  %v1739_v27 = vpop.f32.mrb[28].mxu1 }
 0x1a3   :  { %v1660_v29 = vpop.f32.mrb[29].mxu0  ;;  %v1740_v30 = vpop.f32.mrb[29].mxu1 }
 0x1a4   :  { %v1661_v31 = vadd.f32 %v1660_v29, %v1659_v26  ;;  %v1741_v32 = vadd.f32 %v1740_v30, %v1739_v27 }
 0x1a6   :  { %v2652_v33 = vadd.f32 %v1741_v32, %v1661_v31  ;;  %v1662_v35 = vpop.f32.mrb[30].mxu0  ;;  %v1742_v37 = vpop.f32.mrb[30].mxu1 }
 0x1a7   :  { %v1663_v38 = vpop.f32.mrb[31].mxu0  ;;  %v1743_v39 = vpop.f32.mrb[31].mxu1 }
 0x1a8   :  { %v1664_v40 = vadd.f32 %v1663_v38, %v1662_v35  ;;  %v1744_v41 = vadd.f32 %v1743_v39, %v1742_v37 }
 0x1aa   :  { %v2654_v43 = vadd.f32 %v1744_v41, %v1664_v40  ;;  %v1777_v45 = vpop.f32.mrb[32].mxu0  ;;  %v1857_v46 = vpop.f32.mrb[32].mxu1 }
 0x1ab   :  { %v1778_v47 = vpop.f32.mrb[33].mxu0  ;;  %v1858_v48 = vpop.f32.mrb[33].mxu1 }
 0x1ac   :  { %v1779_v49 = vadd.f32 %v1778_v47, %v1777_v45  ;;  %v1859_v50 = vadd.f32 %v1858_v48, %v1857_v46 }
 0x1ae   :  { %v1022_v61 = vadd.f32 %v1779_v49, %v2624_v42  ;;  %v1780_v56 = vpop.f32.mrb[34].mxu0  ;;  %v1860_v62 = vpop.f32.mrb[34].mxu1 }
 0x1af   :  { %v1781_v2 = vpop.f32.mrb[35].mxu0  ;;  %v1861_v12 = vpop.f32.mrb[35].mxu1 }
 0x1b0   :  { %v1167_v17 = vadd.f32 %v1859_v50, %v1022_v61  ;;  %v1782_v51 = vadd.f32 %v1781_v2, %v1780_v56  ;;  %v1862_v52 = vadd.f32 %v1861_v12, %v1860_v62 }
 0x1b2   :  { %1296 = vst [vmem:[#allocation6] sm:$0xff] %v1167_v17  ;;  %v1027_v53 = vadd.f32 %v1782_v51, %v2626_v58  ;;  %v1783_v54 = vpop.f32.mrb[36].mxu0  ;;  %v1863_v55 = vpop.f32.mrb[36].mxu1 }
 0x1b3   :  { %v1784_v57 = vpop.f32.mrb[37].mxu0  ;;  %v1864_v63 = vpop.f32.mrb[37].mxu1 }
 0x1b4   :  { %v1172_v0 = vadd.f32 %v1862_v52, %v1027_v53  ;;  %v1785_v10 = vadd.f32 %v1784_v57, %v1783_v54  ;;  %v1865_v1 = vadd.f32 %v1864_v63, %v1863_v55 }
 0x1b6   :  { %1297 = vst [vmem:[#allocation6 + $0x8] sm:$0xff] %v1172_v0  ;;  %v1032_v42 = vadd.f32 %v1785_v10, %v2628_v4  ;;  %v1786_v3 = vpop.f32.mrb[38].mxu0  ;;  %v1866_v5 = vpop.f32.mrb[38].mxu1 }
 0x1b7   :  { %v1787_v7 = vpop.f32.mrb[39].mxu0  ;;  %v1867_v8 = vpop.f32.mrb[39].mxu1 }
 0x1b8   :  { %v1177_v9 = vadd.f32 %v1865_v1, %v1032_v42  ;;  %v1788_v11 = vadd.f32 %v1787_v7, %v1786_v3  ;;  %v1868_v14 = vadd.f32 %v1867_v8, %v1866_v5 }
 0x1ba   :  { %1298 = vst [vmem:[#allocation6 + $0x10] sm:$0xff] %v1177_v9  ;;  %v1037_v58 = vadd.f32 %v1788_v11, %v2630_v13  ;;  %v1789_v15 = vpop.f32.mrb[40].mxu0  ;;  %v1869_v18 = vpop.f32.mrb[40].mxu1 }
 0x1bb   :  { %v1790_v19 = vpop.f32.mrb[41].mxu0  ;;  %v1870_v20 = vpop.f32.mrb[41].mxu1 }
 0x1bc   :  { %v1182_v22 = vadd.f32 %v1868_v14, %v1037_v58  ;;  %v1791_v23 = vadd.f32 %v1790_v19, %v1789_v15  ;;  %v1871_v24 = vadd.f32 %v1870_v20, %v1869_v18 }
 0x1be   :  { %1299 = vst [vmem:[#allocation6 + $0x18] sm:$0xff] %v1182_v22  ;;  %v1042_v4 = vadd.f32 %v1791_v23, %v2632_v21  ;;  %v1792_v26 = vpop.f32.mrb[42].mxu0  ;;  %v1872_v27 = vpop.f32.mrb[42].mxu1 }
 0x1bf   :  { %v1793_v29 = vpop.f32.mrb[43].mxu0  ;;  %v1873_v30 = vpop.f32.mrb[43].mxu1 }
 0x1c0   :  { %v1187_v31 = vadd.f32 %v1871_v24, %v1042_v4  ;;  %v1794_v32 = vadd.f32 %v1793_v29, %v1792_v26  ;;  %v1874_v35 = vadd.f32 %v1873_v30, %v1872_v27 }
 0x1c2   :  { %1300 = vst [vmem:[#allocation6 + $0x20] sm:$0xff] %v1187_v31  ;;  %v1047_v13 = vadd.f32 %v1794_v32, %v2634_v28  ;;  %v1795_v37 = vpop.f32.mrb[44].mxu0  ;;  %v1875_v38 = vpop.f32.mrb[44].mxu1 }
 0x1c3   :  { %v1796_v39 = vpop.f32.mrb[45].mxu0  ;;  %v1876_v40 = vpop.f32.mrb[45].mxu1 }
 0x1c4   :  { %v1192_v41 = vadd.f32 %v1874_v35, %v1047_v13  ;;  %v1797_v45 = vadd.f32 %v1796_v39, %v1795_v37  ;;  %v1877_v46 = vadd.f32 %v1876_v40, %v1875_v38 }
 0x1c6   :  { %1301 = vst [vmem:[#allocation6 + $0x28] sm:$0xff] %v1192_v41  ;;  %v1052_v21 = vadd.f32 %v1797_v45, %v2636_v36  ;;  %v1798_v47 = vpop.f32.mrb[46].mxu0  ;;  %v1878_v48 = vpop.f32.mrb[46].mxu1 }
 0x1c7   :  { %v1799_v49 = vpop.f32.mrb[47].mxu0  ;;  %v1879_v50 = vpop.f32.mrb[47].mxu1 }
 0x1c8   :  { %v1197_v61 = vadd.f32 %v1877_v46, %v1052_v21  ;;  %v1800_v56 = vadd.f32 %v1799_v49, %v1798_v47  ;;  %v1880_v62 = vadd.f32 %v1879_v50, %v1878_v48 }
 0x1ca   :  { %1302 = vst [vmem:[#allocation6 + $0x30] sm:$0xff] %v1197_v61  ;;  %v1057_v28 = vadd.f32 %v1800_v56, %v2638_v44  ;;  %v1801_v2 = vpop.f32.mrb[48].mxu0  ;;  %v1881_v12 = vpop.f32.mrb[48].mxu1 }
 0x1cb   :  { %v1802_v17 = vpop.f32.mrb[49].mxu0  ;;  %v1882_v51 = vpop.f32.mrb[49].mxu1 }
 0x1cc   :  { %v1202_v52 = vadd.f32 %v1880_v62, %v1057_v28  ;;  %v1803_v53 = vadd.f32 %v1802_v17, %v1801_v2  ;;  %v1883_v54 = vadd.f32 %v1882_v51, %v1881_v12 }
 0x1ce   :  { %1303 = vst [vmem:[#allocation6 + $0x38] sm:$0xff] %v1202_v52  ;;  %v1062_v36 = vadd.f32 %v1803_v53, %v2640_v60  ;;  %v1804_v55 = vpop.f32.mrb[50].mxu0  ;;  %v1884_v57 = vpop.f32.mrb[50].mxu1 }
 0x1cf   :  { %v1805_v63 = vpop.f32.mrb[51].mxu0  ;;  %v1885_v0 = vpop.f32.mrb[51].mxu1 }
 0x1d0   :  { %v1207_v10 = vadd.f32 %v1883_v54, %v1062_v36  ;;  %v1806_v1 = vadd.f32 %v1805_v63, %v1804_v55  ;;  %v1886_v42 = vadd.f32 %v1885_v0, %v1884_v57 }
 0x1d2   :  { %1304 = vst [vmem:[#allocation6 + $0x40] sm:$0xff] %v1207_v10  ;;  %v1067_v44 = vadd.f32 %v1806_v1, %v2642_v34  ;;  %v1807_v3 = vpop.f32.mrb[52].mxu0  ;;  %v1887_v5 = vpop.f32.mrb[52].mxu1 }
 0x1d3   :  { %v1808_v7 = vpop.f32.mrb[53].mxu0  ;;  %v1888_v8 = vpop.f32.mrb[53].mxu1 }
 0x1d4   :  { %v1212_v9 = vadd.f32 %v1886_v42, %v1067_v44  ;;  %v1809_v11 = vadd.f32 %v1808_v7, %v1807_v3  ;;  %v1889_v14 = vadd.f32 %v1888_v8, %v1887_v5 }
 0x1d6   :  { %1305 = vst [vmem:[#allocation6 + $0x48] sm:$0xff] %v1212_v9  ;;  %v1072_v60 = vadd.f32 %v1809_v11, %v2644_v59  ;;  %v1810_v58 = vpop.f32.mrb[54].mxu0  ;;  %v1890_v15 = vpop.f32.mrb[54].mxu1 }
 0x1d7   :  { %v1811_v18 = vpop.f32.mrb[55].mxu0  ;;  %v1891_v19 = vpop.f32.mrb[55].mxu1 }
 0x1d8   :  { %v1217_v20 = vadd.f32 %v1889_v14, %v1072_v60  ;;  %v1812_v22 = vadd.f32 %v1811_v18, %v1810_v58  ;;  %v1892_v23 = vadd.f32 %v1891_v19, %v1890_v15 }
 0x1da   :  { %1306 = vst [vmem:[#allocation6 + $0x50] sm:$0xff] %v1217_v20  ;;  %v1077_v34 = vadd.f32 %v1812_v22, %v2646_v6  ;;  %v1813_v24 = vpop.f32.mrb[56].mxu0  ;;  %v1893_v4 = vpop.f32.mrb[56].mxu1 }
 0x1db   :  { %v1814_v26 = vpop.f32.mrb[57].mxu0  ;;  %v1894_v27 = vpop.f32.mrb[57].mxu1 }
 0x1dc   :  { %v1222_v29 = vadd.f32 %v1892_v23, %v1077_v34  ;;  %v1815_v30 = vadd.f32 %v1814_v26, %v1813_v24  ;;  %v1895_v31 = vadd.f32 %v1894_v27, %v1893_v4 }
 0x1de   :  { %1307 = vst [vmem:[#allocation6 + $0x58] sm:$0xff] %v1222_v29  ;;  %v1082_v59 = vadd.f32 %v1815_v30, %v2648_v16  ;;  %v1816_v32 = vpop.f32.mrb[58].mxu0  ;;  %v1896_v35 = vpop.f32.mrb[58].mxu1 }
 0x1df   :  { %v1817_v13 = vpop.f32.mrb[59].mxu0  ;;  %v1897_v37 = vpop.f32.mrb[59].mxu1 }
 0x1e0   :  { %v1227_v38 = vadd.f32 %v1895_v31, %v1082_v59  ;;  %v1818_v39 = vadd.f32 %v1817_v13, %v1816_v32  ;;  %v1898_v40 = vadd.f32 %v1897_v37, %v1896_v35 }
 0x1e2   :  { %1308 = vst [vmem:[#allocation6 + $0x60] sm:$0xff] %v1227_v38  ;;  %v1087_v6 = vadd.f32 %v1818_v39, %v2650_v25  ;;  %v1819_v41 = vpop.f32.mrb[60].mxu0  ;;  %v1899_v45 = vpop.f32.mrb[60].mxu1 }
 0x1e3   :  { %v1820_v46 = vpop.f32.mrb[61].mxu0  ;;  %v1900_v21 = vpop.f32.mrb[61].mxu1 }
 0x1e4   :  { %v1232_v47 = vadd.f32 %v1898_v40, %v1087_v6  ;;  %v1821_v48 = vadd.f32 %v1820_v46, %v1819_v41  ;;  %v1901_v49 = vadd.f32 %v1900_v21, %v1899_v45 }
 0x1e6   :  { %1309 = vst [vmem:[#allocation6 + $0x68] sm:$0xff] %v1232_v47  ;;  %v1092_v16 = vadd.f32 %v1821_v48, %v2652_v33  ;;  %v1822_v50 = vpop.f32.mrb[62].mxu0  ;;  %v1902_v61 = vpop.f32.mrb[62].mxu1 }
 0x1e7   :  { %v1823_v56 = vpop.f32.mrb[63].mxu0  ;;  %v1903_v62 = vpop.f32.mrb[63].mxu1 }
 0x1e8   :  { %v1237_v28 = vadd.f32 %v1901_v49, %v1092_v16  ;;  %v1824_v2 = vadd.f32 %v1823_v56, %v1822_v50  ;;  %v1904_v12 = vadd.f32 %v1903_v62, %v1902_v61 }
 0x1ea   :  { %1310 = vst [vmem:[#allocation6 + $0x70] sm:$0xff] %v1237_v28  ;;  %v1097_v25 = vadd.f32 %v1824_v2, %v2654_v43 }
 0x1ec   :  { %v1242_v17 = vadd.f32 %v1904_v12, %v1097_v25 }
 0x1ee   :  { %1311 = vst [vmem:[#allocation6 + $0x78] sm:$0xff] %v1242_v17 }
 0x1ef   :  { %2074 = shalt.err (!%p2071_p12)
}
 0x1f0   :  { %s2075_s3 = scalar_lea.hbm %s2689_s2, 2048 }
 0x1f1   :  { %p2076_p13 = scmp.ne.s32.totalorder %s2689_s2, %s2075_s3  ;;  %p2079_p0 = scmp.lt.u32.totalorder %s2075_s3, %s2689_s2 }
 0x1f3   :  { %p2081_p1 = pnand %p2079_p0, %p2076_p13 }
 0x1f5   :  { %2084 = shalt.err (!%p2081_p1)
}
 0x1f6   :  { %1323 = dma.vmem_to_hbm [thread:$0]  %s1318_s28, 2048, %s2689_s2, [#allocation5], %s2090_s19, %s2090_s19, %s2091_s20  }
 0x1f7   :  { %2087 = dma.done.wait [#allocation5], 2048  }
 0x1f8   :  { %2088 = vsyncadd [#allocation5], 4294965248 }
 0x1f9   :  { %1327 = vsyncpa [#allocation4], 1 }
 0x1fa   :  { %1328 = vsyncpa [#allocation5], 1 }

</bundles_post_ra>
